<compile_context>
chip_gen: v6e
topology: v6e:2x2x1
jax: 0.10.0
libtpu: 0.0.40
codegen_flags: <defaults>
</compile_context>

<pallas_src>
import functools

import jax
import jax.numpy as jnp
from jax.experimental import pallas as pl
from jax.experimental.pallas import tpu as pltpu

_LANE = 128     # lane width (last-dim tile)
_SUBLANE = 8    # f32 sublane count (second-to-last-dim tile)


def _round_up(x, m):
    return (x + m - 1) // m * m


def _mlp_fused_kernel(*refs, n_layers: int):
    """refs = (x_ref, w0_ref, b0_ref, ..., w{L-1}_ref, b{L-1}_ref, o_ref).

    x_ref: [Bp, D0p]; wi_ref: [Dip, D{i+1}p]; bi_ref: [1, D{i+1}p]; o_ref:
    [Bp, DLp]. All shapes are (8, 128)-aligned padded slabs.
    """
    x_ref = refs[0]
    o_ref = refs[-1]
    wb = refs[1:-1]

    h = x_ref[...]
    for i in range(n_layers):
        w = wb[2 * i][...]
        b = wb[2 * i + 1][...]          # [1, N]: in-vreg sublane broadcast
        h = jnp.dot(h, w, preferred_element_type=jnp.float32) + b
        if i != 0:                      # MLPModel: no activation after layer 0
            h = jnp.maximum(h, 0.0)
    o_ref[...] = h.astype(o_ref.dtype)


def mlp_forward(params, x):
    """Fused MLP forward: one pallas_call for the whole Linear/ReLU stack.

    params: list of (w_t, b) with w_t [in, out] (pre-transposed), b [out].
    x: [batch, input_size]. Returns [batch, output_size].
    """
    n_layers = len(params)
    B, k0 = x.shape
    out_dim = params[-1][0].shape[1]

    dims = [k0] + [w.shape[1] for w, _ in params]
    dims_p = [_round_up(d, _LANE) for d in dims]
    Bp = _round_up(B, _SUBLANE)

    # Zero-pad every operand to a lane/sublane-aligned slab (exact; see header).
    x_p = jnp.zeros((Bp, dims_p[0]), x.dtype).at[:B, :k0].set(x)
    flat = []
    for i, (w, b) in enumerate(params):
        kp, np_ = dims_p[i], dims_p[i + 1]
        w_p = jnp.zeros((kp, np_), w.dtype).at[: w.shape[0], : w.shape[1]].set(w)
        b_p = jnp.zeros((1, np_), b.dtype).at[0, : b.shape[0]].set(b)
        flat += [w_p, b_p]

    kernel = functools.partial(_mlp_fused_kernel, n_layers=n_layers)
    out_p = pl.pallas_call(
        kernel,
        out_shape=jax.ShapeDtypeStruct((Bp, dims_p[-1]), x.dtype),
        in_specs=[pl.BlockSpec(memory_space=pltpu.MemorySpace.VMEM)
                  for _ in range(1 + 2 * n_layers)],
        out_specs=pl.BlockSpec(memory_space=pltpu.MemorySpace.VMEM),
    )(x_p, *flat)
    return out_p[:B, :out_dim]


def init_mlp_params(key, input_size, hidden_size, output_size, dtype=jnp.float32):
    """Synthetic params mirroring MLPModel's Linear stack (PyTorch-style init).
    Weights are stored transposed: [in_features, out_features]."""
    dims = [input_size] + list(hidden_size) + [output_size]
    params = []
    for i in range(len(dims) - 1):
        key, kw, kb = jax.random.split(key, 3)
        bound = 1.0 / jnp.sqrt(dims[i])
        w_t = jax.random.uniform(kw, (dims[i], dims[i + 1]),
                                 minval=-bound, maxval=bound, dtype=dtype)
        b = jax.random.uniform(kb, (dims[i + 1],),
                               minval=-bound, maxval=bound, dtype=dtype)
        params.append((w_t, b))
    return params


def mlp_reference(params, x):
    """Plain-JAX reference matching MLPModel.forward."""
    for i, (w_t, b) in enumerate(params):
        x = x @ w_t + b
        if i != 0:
            x = jnp.maximum(x, 0.0)
    return x


if __name__ == "__main__":
    input_size = 16
    hidden_size = [32, 32]
    output_size = 8
    batch = 4

    key = jax.random.PRNGKey(0)
    key, kx = jax.random.split(key)
    x = jax.random.normal(kx, (batch, input_size), dtype=jnp.float32)
    params = init_mlp_params(key, input_size, hidden_size, output_size)

    fwd = jax.jit(mlp_forward)
    y = jax.block_until_ready(fwd(params, x))

    y_ref = mlp_reference(params, x)
    assert y.shape == (batch, output_size)
    assert jnp.allclose(y, y_ref, atol=1e-5, rtol=1e-5)

    print("KERNEL_OK")
</pallas_src>

<mosaic_0001>
module attributes {stable_mosaic.version = 11 : i64} {
  func.func @_mlp_fused_kernel(%arg0: memref<8x128xf32, #tpu.memory_space<vmem>>, %arg1: memref<128x128xf32, #tpu.memory_space<vmem>>, %arg2: memref<1x128xf32, #tpu.memory_space<vmem>>, %arg3: memref<128x128xf32, #tpu.memory_space<vmem>>, %arg4: memref<1x128xf32, #tpu.memory_space<vmem>>, %arg5: memref<128x128xf32, #tpu.memory_space<vmem>>, %arg6: memref<1x128xf32, #tpu.memory_space<vmem>>, %arg7: memref<8x128xf32, #tpu.memory_space<vmem>>) attributes {dimension_semantics = [], scalar_prefetch = 0 : i64, scratch_operands = 0 : i64, tpu.core_type = #tpu.core_type<tc>} {
    %c0 = arith.constant 0 : index
    %c0_0 = arith.constant 0 : index
    %0 = vector.load %arg0[%c0, %c0_0] : memref<8x128xf32, #tpu.memory_space<vmem>>, vector<8x128xf32>
    %c0_1 = arith.constant 0 : index
    %c0_2 = arith.constant 0 : index
    %1 = vector.load %arg1[%c0_1, %c0_2] : memref<128x128xf32, #tpu.memory_space<vmem>>, vector<128x128xf32>
    %c0_3 = arith.constant 0 : index
    %c0_4 = arith.constant 0 : index
    %2 = vector.load %arg2[%c0_3, %c0_4] : memref<1x128xf32, #tpu.memory_space<vmem>>, vector<1x128xf32>
    %cst = arith.constant dense<0.000000e+00> : vector<8x128xf32>
    %3 = tpu.matmul %0, %1, %cst {dimension_numbers = #tpu.dot_dimension_numbers<[1], [0], [0], [1], [0, 0, 1, 1], [], []>} : vector<8x128xf32>, vector<128x128xf32>, vector<8x128xf32> -> vector<8x128xf32>
    %4 = vector.broadcast %2 : vector<1x128xf32> to vector<8x128xf32>
    %5 = arith.addf %3, %4 : vector<8x128xf32>
    %c0_5 = arith.constant 0 : index
    %c0_6 = arith.constant 0 : index
    %6 = vector.load %arg3[%c0_5, %c0_6] : memref<128x128xf32, #tpu.memory_space<vmem>>, vector<128x128xf32>
    %c0_7 = arith.constant 0 : index
    %c0_8 = arith.constant 0 : index
    %7 = vector.load %arg4[%c0_7, %c0_8] : memref<1x128xf32, #tpu.memory_space<vmem>>, vector<1x128xf32>
    %cst_9 = arith.constant dense<0.000000e+00> : vector<8x128xf32>
    %8 = tpu.matmul %5, %6, %cst_9 {dimension_numbers = #tpu.dot_dimension_numbers<[1], [0], [0], [1], [0, 0, 1, 1], [], []>} : vector<8x128xf32>, vector<128x128xf32>, vector<8x128xf32> -> vector<8x128xf32>
    %9 = vector.broadcast %7 : vector<1x128xf32> to vector<8x128xf32>
    %10 = arith.addf %8, %9 : vector<8x128xf32>
    %cst_10 = arith.constant 0.000000e+00 : f32
    %11 = vector.broadcast %cst_10 : f32 to vector<8x128xf32>
    %12 = arith.maximumf %10, %11 : vector<8x128xf32>
    %c0_11 = arith.constant 0 : index
    %c0_12 = arith.constant 0 : index
    %13 = vector.load %arg5[%c0_11, %c0_12] : memref<128x128xf32, #tpu.memory_space<vmem>>, vector<128x128xf32>
    %c0_13 = arith.constant 0 : index
    %c0_14 = arith.constant 0 : index
    %14 = vector.load %arg6[%c0_13, %c0_14] : memref<1x128xf32, #tpu.memory_space<vmem>>, vector<1x128xf32>
    %cst_15 = arith.constant dense<0.000000e+00> : vector<8x128xf32>
    %15 = tpu.matmul %12, %13, %cst_15 {dimension_numbers = #tpu.dot_dimension_numbers<[1], [0], [0], [1], [0, 0, 1, 1], [], []>} : vector<8x128xf32>, vector<128x128xf32>, vector<8x128xf32> -> vector<8x128xf32>
    %16 = vector.broadcast %14 : vector<1x128xf32> to vector<8x128xf32>
    %17 = arith.addf %15, %16 : vector<8x128xf32>
    %cst_16 = arith.constant 0.000000e+00 : f32
    %18 = vector.broadcast %cst_16 : f32 to vector<8x128xf32>
    %19 = arith.maximumf %17, %18 : vector<8x128xf32>
    %c0_17 = arith.constant 0 : index
    %c0_18 = arith.constant 0 : index
    %20 = vector.load %arg7[%c0_17, %c0_18] : memref<8x128xf32, #tpu.memory_space<vmem>>, vector<8x128xf32>
    tpu.vector_store %arg7[%c0_17, %c0_18], %19 {strides = array<i32>} : memref<8x128xf32, #tpu.memory_space<vmem>>, vector<8x128xf32>,
    return
  }
}

</mosaic_0001>

<bundles_post_ra>
// kernel: mlp_forward.1
= control target key start
LH: loop header
LB: loop body
LE: loop exit
PB: predicated region body
PF: predicated region fallthrough
CT: control target
= control target key end

     0   :  { %v474_v0 = vmov 0.0   ;;  %vm475_vm0 = vmmov 0   ;;  %s729_s1 = inlined_call_operand.vmem [shape: f32[128,128], index: 1, kind: input, shape index: {}]   ;;  %s730_s3 = inlined_call_operand.vmem [shape: f32[128,128], index: 3, kind: input, shape index: {}]   ;;  %s731_s0 = inlined_call_operand.vmem [shape: f32[8,128], index: 0, kind: input, shape index: {}]   ;;  %s732_s5 = inlined_call_operand.vmem [shape: f32[128,128], index: 5, kind: input, shape index: {}]   ;;  %s733_s2 = inlined_call_operand.vmem [shape: f32[1,128], index: 2, kind: input, shape index: {}]   ;;  %s734_s4 = inlined_call_operand.vmem [shape: f32[1,128], index: 4, kind: input, shape index: {}]   ;;  %s735_s6 = inlined_call_operand.vmem [shape: f32[1,128], index: 6, kind: input, shape index: {}]   ;;  %s736_s7 = inlined_call_operand.vmem [shape: f32[8,128], index: 7, kind: output, shape index: {}]  }
   0x1   :  { %367 = vmatprep.subr.mxu0 %v474_v0  ;;  %v42_v1 = vld [vmem:[%s729_s1 + $0x78] sm:$0xff]  ;;  %v41_v2 = vld [vmem:[%s729_s1 + $0x70] sm:$0xff]  ;;  %399 = vmatprep.mubr.msk.f32.mxu0 %vm475_vm0, %v474_v0  ;;  %v40_v3 = vld [vmem:[%s729_s1 + $0x68] sm:$0xff] }
   0x2   :  { %368 = vmatpush3.msra.mxu0 %v42_v1  ;;  %402 = vmatprep.subr.mxu1 %v474_v0  ;;  %v39_v4 = vld [vmem:[%s729_s1 + $0x60] sm:$0xff]  ;;  %v135_v5 = vld [vmem:[%s730_s3 + $0x78] sm:$0xff]  ;;  %v134_v7 = vld [vmem:[%s730_s3 + $0x70] sm:$0xff] }
   0x3   :  { %369 = vmatprep.subr.mxu0 %v474_v0  ;;  %434 = vmatprep.mubr.msk.f32.mxu1 %vm475_vm0, %v474_v0  ;;  %v38_v6 = vld [vmem:[%s729_s1 + $0x58] sm:$0xff]  ;;  %v133_v8 = vld [vmem:[%s730_s3 + $0x68] sm:$0xff]  ;;  %v37_v9 = vld [vmem:[%s729_s1 + $0x50] sm:$0xff] }
   0x4   :  { %370 = vmatpush3.msra.mxu0 %v41_v2  ;;  %403 = vmatpush3.msra.mxu1 %v135_v5  ;;  %v132_v10 = vld [vmem:[%s730_s3 + $0x60] sm:$0xff]  ;;  %v36_v11 = vld [vmem:[%s729_s1 + $0x48] sm:$0xff]  ;;  %v131_v12 = vld [vmem:[%s730_s3 + $0x58] sm:$0xff] }
   0x5   :  { %371 = vmatprep.subr.mxu0 %v474_v0  ;;  %404 = vmatprep.subr.mxu1 %v474_v0  ;;  %v35_v13 = vld [vmem:[%s729_s1 + $0x40] sm:$0xff]  ;;  %v130_v14 = vld [vmem:[%s730_s3 + $0x50] sm:$0xff]  ;;  %v34_v15 = vld [vmem:[%s729_s1 + $0x38] sm:$0xff] }
   0x6   :  { %372 = vmatpush3.msra.mxu0 %v40_v3  ;;  %405 = vmatpush3.msra.mxu1 %v134_v7  ;;  %v129_v16 = vld [vmem:[%s730_s3 + $0x48] sm:$0xff]  ;;  %v33_v17 = vld [vmem:[%s729_s1 + $0x30] sm:$0xff]  ;;  %v128_v18 = vld [vmem:[%s730_s3 + $0x40] sm:$0xff] }
   0x7   :  { %373 = vmatprep.subr.mxu0 %v474_v0  ;;  %406 = vmatprep.subr.mxu1 %v474_v0  ;;  %v32_v19 = vld [vmem:[%s729_s1 + $0x28] sm:$0xff]  ;;  %v127_v20 = vld [vmem:[%s730_s3 + $0x38] sm:$0xff]  ;;  %v31_v21 = vld [vmem:[%s729_s1 + $0x20] sm:$0xff] }
   0x8   :  { %374 = vmatpush3.msra.mxu0 %v39_v4  ;;  %407 = vmatpush3.msra.mxu1 %v133_v8  ;;  %v126_v22 = vld [vmem:[%s730_s3 + $0x30] sm:$0xff]  ;;  %v30_v23 = vld [vmem:[%s729_s1 + $0x18] sm:$0xff]  ;;  %v125_v24 = vld [vmem:[%s730_s3 + $0x28] sm:$0xff] }
   0x9   :  { %375 = vmatprep.subr.mxu0 %v474_v0  ;;  %408 = vmatprep.subr.mxu1 %v474_v0  ;;  %v29_v25 = vld [vmem:[%s729_s1 + $0x10] sm:$0xff]  ;;  %v124_v26 = vld [vmem:[%s730_s3 + $0x20] sm:$0xff]  ;;  %v28_v27 = vld [vmem:[%s729_s1 + $0x8] sm:$0xff] }
   0xa   :  { %376 = vmatpush3.msra.mxu0 %v38_v6  ;;  %409 = vmatpush3.msra.mxu1 %v132_v10  ;;  %v123_v28 = vld [vmem:[%s730_s3 + $0x18] sm:$0xff]  ;;  %v27_v29 = vld [vmem:[%s729_s1] sm:$0xff]  ;;  %v122_v31 = vld [vmem:[%s730_s3 + $0x10] sm:$0xff] }
   0xb   :  { %377 = vmatprep.subr.mxu0 %v474_v0  ;;  %410 = vmatprep.subr.mxu1 %v474_v0  ;;  %v26_v30 = vld [vmem:[%s731_s0] sm:$0xff]  ;;  %v121_v32 = vld [vmem:[%s730_s3 + $0x8] sm:$0xff]  ;;  %v229_v34 = vld [vmem:[%s732_s5 + $0x78] sm:$0xff] }
   0xc   :  { %378 = vmatpush3.msra.mxu0 %v37_v9  ;;  %411 = vmatpush3.msra.mxu1 %v131_v12  ;;  %v120_v33 = vld [vmem:[%s730_s3] sm:$0xff]  ;;  %v228_v35 = vld [vmem:[%s732_s5 + $0x70] sm:$0xff]  ;;  %v227_v36 = vld [vmem:[%s732_s5 + $0x68] sm:$0xff] }
   0xd   :  { %379 = vmatprep.subr.mxu0 %v474_v0  ;;  %412 = vmatprep.subr.mxu1 %v474_v0  ;;  %v226_v37 = vld [vmem:[%s732_s5 + $0x60] sm:$0xff]  ;;  %v225_v38 = vld [vmem:[%s732_s5 + $0x58] sm:$0xff]  ;;  %v224_v39 = vld [vmem:[%s732_s5 + $0x50] sm:$0xff] }
   0xe   :  { %380 = vmatpush3.msra.mxu0 %v36_v11  ;;  %413 = vmatpush3.msra.mxu1 %v130_v14  ;;  %v223_v40 = vld [vmem:[%s732_s5 + $0x48] sm:$0xff]  ;;  %v222_v41 = vld [vmem:[%s732_s5 + $0x40] sm:$0xff]  ;;  %v221_v42 = vld [vmem:[%s732_s5 + $0x38] sm:$0xff] }
   0xf   :  { %381 = vmatprep.subr.mxu0 %v474_v0  ;;  %414 = vmatprep.subr.mxu1 %v474_v0  ;;  %v220_v43 = vld [vmem:[%s732_s5 + $0x30] sm:$0xff]  ;;  %v219_v44 = vld [vmem:[%s732_s5 + $0x28] sm:$0xff]  ;;  %v218_v45 = vld [vmem:[%s732_s5 + $0x20] sm:$0xff] }
  0x10   :  { %382 = vmatpush3.msra.mxu0 %v35_v13  ;;  %415 = vmatpush3.msra.mxu1 %v129_v16  ;;  %v217_v46 = vld [vmem:[%s732_s5 + $0x18] sm:$0xff]  ;;  %v313_v47 = vld [vmem:[%s733_s2] ss:$0 sm:$0xff]  ;;  %v216_v51 = vld [vmem:[%s732_s5 + $0x10] sm:$0xff] }
  0x11   :  { %383 = vmatprep.subr.mxu0 %v474_v0  ;;  %416 = vmatprep.subr.mxu1 %v474_v0  ;;  %v215_v52 = vld [vmem:[%s732_s5 + $0x8] sm:$0xff]  ;;  %v214_v53 = vld [vmem:[%s732_s5] sm:$0xff] }
  0x12   :  { %384 = vmatpush3.msra.mxu0 %v34_v15  ;;  %417 = vmatpush3.msra.mxu1 %v128_v18  ;;  %v314_v54 = vld [vmem:[%s734_s4] ss:$0 sm:$0xff] }
  0x13   :  { %385 = vmatprep.subr.mxu0 %v474_v0  ;;  %418 = vmatprep.subr.mxu1 %v474_v0  ;;  %v315_v59 = vld [vmem:[%s735_s6] ss:$0 sm:$0xff] }
  0x14   :  { %386 = vmatpush3.msra.mxu0 %v33_v17  ;;  %419 = vmatpush3.msra.mxu1 %v127_v20 }
  0x15   :  { %387 = vmatprep.subr.mxu0 %v474_v0  ;;  %420 = vmatprep.subr.mxu1 %v474_v0 }
  0x16   :  { %388 = vmatpush3.msra.mxu0 %v32_v19  ;;  %421 = vmatpush3.msra.mxu1 %v126_v22 }
  0x17   :  { %389 = vmatprep.subr.mxu0 %v474_v0  ;;  %422 = vmatprep.subr.mxu1 %v474_v0 }
  0x18   :  { %390 = vmatpush3.msra.mxu0 %v31_v21  ;;  %423 = vmatpush3.msra.mxu1 %v125_v24 }
  0x19   :  { %391 = vmatprep.subr.mxu0 %v474_v0  ;;  %424 = vmatprep.subr.mxu1 %v474_v0 }
  0x1a   :  { %392 = vmatpush3.msra.mxu0 %v30_v23  ;;  %425 = vmatpush3.msra.mxu1 %v124_v26 }
  0x1b   :  { %393 = vmatprep.subr.mxu0 %v474_v0  ;;  %426 = vmatprep.subr.mxu1 %v474_v0 }
  0x1c   :  { %394 = vmatpush3.msra.mxu0 %v29_v25  ;;  %427 = vmatpush3.msra.mxu1 %v123_v28 }
  0x1d   :  { %395 = vmatprep.subr.mxu0 %v474_v0  ;;  %428 = vmatprep.subr.mxu1 %v474_v0 }
  0x1e   :  { %396 = vmatpush3.msra.mxu0 %v28_v27  ;;  %429 = vmatpush3.msra.mxu1 %v122_v31 }
  0x1f   :  { %397 = vmatprep.subr.mxu0 %v474_v0  ;;  %430 = vmatprep.subr.mxu1 %v474_v0 }
  0x20   :  { %398 = vmatpush3.msra.mxu0 %v27_v29  ;;  %431 = vmatpush3.msra.mxu1 %v121_v32 }
  0x21   :  { %400 = vmatmul.mubr.f32.vlgmr.msra.gmra.mxu0 %v26_v30  ;;  %437 = vmatprep.subr.mxu0 %v474_v0 }
  0x22   :  { %469 = vmatprep.mubr.msk.f32.mxu0 %vm475_vm0, %v474_v0  ;;  %432 = vmatprep.subr.mxu1 %v474_v0 }
  0x23   :  { %433 = vmatpush3.msra.mxu1 %v120_v33  ;;  %438 = vmatpush3.msra.mxu0 %v229_v34 }
  0x24   :  { %439 = vmatprep.subr.mxu0 %v474_v0 }
  0x25   :  { %440 = vmatpush3.msra.mxu0 %v228_v35 }
  0x26   :  { %441 = vmatprep.subr.mxu0 %v474_v0 }
  0x27   :  { %442 = vmatpush3.msra.mxu0 %v227_v36 }
  0x28   :  { %443 = vmatprep.subr.mxu0 %v474_v0 }
  0x29   :  { %444 = vmatpush3.msra.mxu0 %v226_v37 }
  0x2a   :  { %445 = vmatprep.subr.mxu0 %v474_v0 }
  0x2b   :  { %446 = vmatpush3.msra.mxu0 %v225_v38 }
  0x2c   :  { %447 = vmatprep.subr.mxu0 %v474_v0 }
  0x2d   :  { %448 = vmatpush3.msra.mxu0 %v224_v39 }
  0x2e   :  { %449 = vmatprep.subr.mxu0 %v474_v0 }
  0x2f   :  { %450 = vmatpush3.msra.mxu0 %v223_v40 }
  0x30   :  { %451 = vmatprep.subr.mxu0 %v474_v0 }
  0x31   :  { %452 = vmatpush3.msra.mxu0 %v222_v41 }
  0x32   :  { %453 = vmatprep.subr.mxu0 %v474_v0 }
  0x33   :  { %454 = vmatpush3.msra.mxu0 %v221_v42 }
  0x34   :  { %455 = vmatprep.subr.mxu0 %v474_v0 }
  0x35   :  { %456 = vmatpush3.msra.mxu0 %v220_v43 }
  0x36   :  { %457 = vmatprep.subr.mxu0 %v474_v0 }
  0x37   :  { %458 = vmatpush3.msra.mxu0 %v219_v44 }
  0x38   :  { %459 = vmatprep.subr.mxu0 %v474_v0 }
  0x39   :  { %460 = vmatpush3.msra.mxu0 %v218_v45 }
  0x3a   :  { %461 = vmatprep.subr.mxu0 %v474_v0 }
  0x3b   :  { %462 = vmatpush3.msra.mxu0 %v217_v46 }
  0x3c   :  { %463 = vmatprep.subr.mxu0 %v474_v0 }
  0x3d   :  { %464 = vmatpush3.msra.mxu0 %v216_v51 }
  0x3e   :  { %465 = vmatprep.subr.mxu0 %v474_v0 }
  0x3f   :  { %466 = vmatpush3.msra.mxu0 %v215_v52 }
  0x40   :  { %467 = vmatprep.subr.mxu0 %v474_v0 }
  0x41   :  { %468 = vmatpush3.msra.mxu0 %v214_v53 }
  0xe1   :  { %v116_v48 = vpop.f32.mrf.mxu0 }
  0xe2   :  { %v117_v49 = vadd.f32 %v313_v47, %v116_v48 }
  0xe3   :  { %v401_v50 = vpop.f32.mrf.mxu0 }
  0xe4   :  { %435 = vmatmul.mubr.f32.vlgmr.msra.gmra.mxu1 %v117_v49 }
 0x1a4   :  { %v209_v55 = vpop.f32.mrf.mxu1 }
 0x1a5   :  { %v210_v56 = vadd.f32 %v314_v54, %v209_v55 }
 0x1a6   :  { %v436_v57 = vpop.f32.mrf.mxu1 }
 0x1a7   :  { %v213_v58 = vmax.f32 %v210_v56, 0.0 }
 0x1a9   :  { %470 = vmatmul.mubr.f32.vlgmr.msra.gmra.mxu0 %v213_v58 }
 0x269   :  { %v303_v60 = vpop.f32.mrf.mxu0 }
 0x26a   :  { %v304_v61 = vadd.f32 %v315_v59, %v303_v60 }
 0x26b   :  { %v471_v62 = vpop.f32.mrf.mxu0 }
 0x26c   :  { %v307_v63 = vmax.f32 %v304_v61, 0.0 }
 0x26e   :  { %308 = vst [vmem:[%s736_s7] sm:$0xff] %v307_v63 }

</bundles_post_ra>
